<compile_context>
chip_gen: v7x
topology: tpu7x:2x2x1
jax: 0.10.0
libtpu: 0.0.40
codegen_flags: <defaults>
</compile_context>

<pallas_src>
import functools

import jax
import jax.numpy as jnp
from jax.experimental import pallas as pl
from jax.experimental.pallas import tpu as pltpu

# YOLOLoss defaults: alpha=0.25, gamma=2.
GAMMA = 2.0
ALPHA = 0.25

LANES = 128
MAX_BLOCK_ROWS = 2048      # (2048, 128) f32 = 1 MiB per input block
NUM_CHUNKS = 2             # leading "parallel" grid axis -> 2 TensorCores on v7x


def _round_up(a, b):
    return ((a + b - 1) // b) * b


def _focal_conf_kernel(pred_ref, true_ref, out_ref, *, gamma, alpha):
    s = pl.program_id(1)                     # inner reduction axis ("arbitrary")

    @pl.when(s == 0)
    def _init():
        out_ref[...] = jnp.zeros_like(out_ref)

    x = pred_ref[...].astype(jnp.float32)
    y = true_ref[...].astype(jnp.float32)

    # One shared transcendental: e = exp(-|x|) feeds both the stable BCE-with-logits
    # (equivalent to the module's BCELoss on clipped sigmoid probabilities) and sigmoid.
    e = jnp.exp(-jnp.abs(x))
    bce = jnp.maximum(x, 0.0) - x * y + jnp.log1p(e)

    one_plus_e = 1.0 + e
    inv = pl.reciprocal(one_plus_e, approx=True)      # EUP slot (cheap)
    inv = inv * (2.0 - one_plus_e * inv)              # one Newton step on the VPU -> ~f32 exact
    p = jnp.where(x >= 0.0, inv, e * inv)             # sigmoid(x)

    p_t = y * p + (1.0 - y) * (1.0 - p)
    alpha_factor = y * alpha + (1.0 - y) * (1.0 - alpha)
    z = 1.0 - p_t
    if gamma == 2.0:
        modulating = z * z
    elif gamma == 1.5:
        modulating = z * jnp.sqrt(z)                  # avoids pow -> exp(g*log(z)) and log(0)
    elif gamma == 1.0:
        modulating = z
    else:
        modulating = z ** gamma

    loss = bce * alpha_factor * modulating            # (block_rows, 128)

    # Reduce only along the leading axis (pure VPU adds across vregs); keep the accumulator
    # vreg-shaped.  The final cross-lane/sublane reduce happens once, in the wrapper.
    partial = loss.reshape(-1, 8, LANES).sum(axis=0)  # (8, 128)
    out_ref[...] = out_ref[...] + partial.reshape(1, 8, LANES)


def focal_conf_loss(pred, true, *, gamma=GAMMA, alpha=ALPHA,
                    max_block_rows=MAX_BLOCK_ROWS, num_chunks=NUM_CHUNKS):
    """mean( BCEWithLogits(pred, true) * alpha_factor * (1 - p_t)**gamma )

    The focal confidence-loss term of YOLOLoss.forward() (up to the scalar
    focal_loss_ratio / balance[l] / obj_ratio multipliers applied outside).
    pred: conf logits, true: binary obj targets, any matching shape (e.g. [B, A, H, W]).
    """
    assert pred.shape == true.shape
    total_n = pred.size

    pred_flat = pred.reshape(-1)
    true_flat = true.reshape(-1)

    rows = (total_n + LANES - 1) // LANES
    block_rows = min(max_block_rows, _round_up(rows, 8))
    num_blocks = (rows + block_rows - 1) // block_rows
    chunks = min(num_chunks, num_blocks)
    steps = (num_blocks + chunks - 1) // chunks
    padded_rows = chunks * steps * block_rows

    pad = padded_rows * LANES - total_n
    if pad:
        # Padding with (logit = -1e4, target = 0) contributes exactly 0 to the loss sum.
        pred_flat = jnp.concatenate(
            [pred_flat, jnp.full((pad,), -1e4, dtype=pred_flat.dtype)])
        true_flat = jnp.concatenate(
            [true_flat, jnp.zeros((pad,), dtype=true_flat.dtype)])

    # Keep native dtype (no wrapper upcast); cast to f32 inside the kernel.
    pred2d = pred_flat.reshape(padded_rows, LANES)
    true2d = true_flat.reshape(padded_rows, LANES)

    kernel = functools.partial(_focal_conf_kernel, gamma=gamma, alpha=alpha)

    in_spec = pl.BlockSpec((block_rows, LANES), lambda c, s: (c * steps + s, 0))
    # NOTE: if profiling still shows exposed DMA at real sizes, add
    # pipeline_mode=pl.Buffered(3) to the input specs (watch VMEM on v7x).

    partials = pl.pallas_call(
        kernel,
        out_shape=jax.ShapeDtypeStruct((chunks, 8, LANES), jnp.float32),
        grid_spec=pltpu.PrefetchScalarGridSpec(
            num_scalar_prefetch=0,
            grid=(chunks, steps),
            in_specs=[in_spec, in_spec],
            out_specs=pl.BlockSpec((1, 8, LANES), lambda c, s: (c, 0, 0)),
        ),
        compiler_params=pltpu.CompilerParams(
            dimension_semantics=("parallel", "arbitrary")),
    )(pred2d, true2d)

    return jnp.sum(partials) / jnp.float32(total_n)


def focal_loss_ref(pred, true, *, gamma=GAMMA, alpha=ALPHA):
    """Pure-JAX reference mirroring the PyTorch focal confidence loss."""
    x = pred.astype(jnp.float32)
    y = true.astype(jnp.float32)
    bce = jnp.maximum(x, 0.0) - x * y + jnp.log1p(jnp.exp(-jnp.abs(x)))
    p = jax.nn.sigmoid(x)
    p_t = y * p + (1.0 - y) * (1.0 - p)
    alpha_factor = y * alpha + (1.0 - y) * (1.0 - alpha)
    modulating = (1.0 - p_t) ** gamma
    return jnp.mean(bce * alpha_factor * modulating)


if __name__ == "__main__":
    key = jax.random.PRNGKey(0)
    k1, k2, k3, k4 = jax.random.split(key, 4)

    # Small conf-logit / obj-target maps as YOLOLoss sees them: (bs, anchors, in_h, in_w).
    x = jax.random.normal(k1, (2, 4, 16, 16), dtype=jnp.float32) * 2.0
    t = (jax.random.uniform(k2, (2, 4, 16, 16)) > 0.7).astype(jnp.float32)

    out = jax.block_until_ready(focal_conf_loss(x, t))
    ref = focal_loss_ref(x, t)
    assert jnp.allclose(out, ref, rtol=2e-4, atol=1e-6), (out, ref)

    # Second (still small) check exercising padding, the 2-chunk "parallel" axis and a
    # multi-step reduction: a YOLO-head-shaped tensor (bs, 3, 5+20, 20, 20).
    x2 = jax.random.normal(k3, (2, 3, 25, 20, 20), dtype=jnp.float32) * 2.0
    t2 = (jax.random.uniform(k4, (2, 3, 25, 20, 20)) > 0.7).astype(jnp.float32)
    out2 = jax.block_until_ready(focal_conf_loss(x2, t2, max_block_rows=64))
    ref2 = focal_loss_ref(x2, t2)
    assert jnp.allclose(out2, ref2, rtol=2e-4, atol=1e-6), (out2, ref2)

    print("KERNEL_OK")
</pallas_src>

<mosaic_0001>
module attributes {stable_mosaic.version = 11 : i64} {
  func.func @_focal_conf_kernel(%arg0: i32, %arg1: i32, %arg2: memref<16x128xf32, #tpu.memory_space<vmem>>, %arg3: memref<16x128xf32, #tpu.memory_space<vmem>>, %arg4: memref<1x8x128xf32, #tpu.memory_space<vmem>>) attributes {dimension_semantics = [#tpu.dimension_semantics<parallel>, #tpu.dimension_semantics<arbitrary>], iteration_bounds = array<i64: 1, 1>, scalar_prefetch = 0 : i64, scratch_operands = 0 : i64, tpu.core_type = #tpu.core_type<tc>, window_params = [{transform_indices = @transform_0, window_bounds = array<i64: 16, 128>}, {transform_indices = @transform_1, window_bounds = array<i64: 16, 128>}, {transform_indices = @transform_2, window_bounds = array<i64: 1, 8, 128>}]} {
    %c0_i32 = arith.constant 0 : i32
    %0 = arith.cmpi eq, %arg1, %c0_i32 : i32
    %1 = arith.extui %0 : i1 to i32
    %c0_i32_0 = arith.constant 0 : i32
    %2 = arith.cmpi ne, %1, %c0_i32_0 : i32
    scf.if %2 {
      %cst_21 = arith.constant 0.000000e+00 : f32
      %51 = vector.broadcast %cst_21 : f32 to vector<1x8x128xf32>
      %c0_22 = arith.constant 0 : index
      %c0_23 = arith.constant 0 : index
      %c0_24 = arith.constant 0 : index
      %52 = vector.load %arg4[%c0_22, %c0_23, %c0_24] : memref<1x8x128xf32, #tpu.memory_space<vmem>>, vector<1x8x128xf32>
      tpu.vector_store %arg4[%c0_22, %c0_23, %c0_24], %51 {strides = array<i32>} : memref<1x8x128xf32, #tpu.memory_space<vmem>>, vector<1x8x128xf32>,
    } else {
    }
    %c0 = arith.constant 0 : index
    %c0_1 = arith.constant 0 : index
    %3 = vector.load %arg2[%c0, %c0_1] : memref<16x128xf32, #tpu.memory_space<vmem>>, vector<16x128xf32>
    %c0_2 = arith.constant 0 : index
    %c0_3 = arith.constant 0 : index
    %4 = vector.load %arg3[%c0_2, %c0_3] : memref<16x128xf32, #tpu.memory_space<vmem>>, vector<16x128xf32>
    %5 = math.absf %3 : vector<16x128xf32>
    %cst = arith.constant 0.000000e+00 : f32
    %6 = vector.broadcast %cst : f32 to vector<16x128xf32>
    %7 = arith.subf %6, %5 : vector<16x128xf32>
    %8 = math.exp %7 : vector<16x128xf32>
    %cst_4 = arith.constant 0.000000e+00 : f32
    %9 = vector.broadcast %cst_4 : f32 to vector<16x128xf32>
    %10 = arith.maximumf %3, %9 : vector<16x128xf32>
    %11 = arith.mulf %3, %4 : vector<16x128xf32>
    %12 = arith.subf %10, %11 : vector<16x128xf32>
    %13 = math.log1p %8 : vector<16x128xf32>
    %14 = arith.addf %12, %13 : vector<16x128xf32>
    %cst_5 = arith.constant 1.000000e+00 : f32
    %15 = vector.broadcast %cst_5 : f32 to vector<16x128xf32>
    %16 = arith.addf %15, %8 : vector<16x128xf32>
    %17 = tpu.reciprocal %16 {approx = true} : vector<16x128xf32> -> vector<16x128xf32>
    %18 = arith.mulf %16, %17 : vector<16x128xf32>
    %cst_6 = arith.constant 2.000000e+00 : f32
    %19 = vector.broadcast %cst_6 : f32 to vector<16x128xf32>
    %20 = arith.subf %19, %18 : vector<16x128xf32>
    %21 = arith.mulf %17, %20 : vector<16x128xf32>
    %cst_7 = arith.constant 0.000000e+00 : f32
    %22 = vector.broadcast %cst_7 : f32 to vector<16x128xf32>
    %23 = arith.cmpf oge, %3, %22 : vector<16x128xf32>
    %24 = arith.mulf %8, %21 : vector<16x128xf32>
    %25 = arith.select %23, %21, %24 : vector<16x128xi1>, vector<16x128xf32>
    %26 = arith.mulf %4, %25 : vector<16x128xf32>
    %cst_8 = arith.constant 1.000000e+00 : f32
    %27 = vector.broadcast %cst_8 : f32 to vector<16x128xf32>
    %28 = arith.subf %27, %4 : vector<16x128xf32>
    %cst_9 = arith.constant 1.000000e+00 : f32
    %29 = vector.broadcast %cst_9 : f32 to vector<16x128xf32>
    %30 = arith.subf %29, %25 : vector<16x128xf32>
    %31 = arith.mulf %28, %30 : vector<16x128xf32>
    %32 = arith.addf %26, %31 : vector<16x128xf32>
    %cst_10 = arith.constant 2.500000e-01 : f32
    %33 = vector.broadcast %cst_10 : f32 to vector<16x128xf32>
    %34 = arith.mulf %4, %33 : vector<16x128xf32>
    %cst_11 = arith.constant 1.000000e+00 : f32
    %35 = vector.broadcast %cst_11 : f32 to vector<16x128xf32>
    %36 = arith.subf %35, %4 : vector<16x128xf32>
    %cst_12 = arith.constant 7.500000e-01 : f32
    %37 = vector.broadcast %cst_12 : f32 to vector<16x128xf32>
    %38 = arith.mulf %36, %37 : vector<16x128xf32>
    %39 = arith.addf %34, %38 : vector<16x128xf32>
    %cst_13 = arith.constant 1.000000e+00 : f32
    %40 = vector.broadcast %cst_13 : f32 to vector<16x128xf32>
    %41 = arith.subf %40, %32 : vector<16x128xf32>
    %42 = arith.mulf %41, %41 : vector<16x128xf32>
    %43 = arith.mulf %14, %39 : vector<16x128xf32>
    %44 = arith.mulf %43, %42 : vector<16x128xf32>
    %45 = vector.shape_cast %44 : vector<16x128xf32> to vector<2x8x128xf32>
    %cst_14 = arith.constant dense<0.000000e+00> : vector<8x128xf32>
    %46 = vector.multi_reduction <add>, %45, %cst_14 [0] : vector<2x8x128xf32> to vector<8x128xf32>
    %c0_15 = arith.constant 0 : index
    %c0_16 = arith.constant 0 : index
    %c0_17 = arith.constant 0 : index
    %47 = vector.load %arg4[%c0_15, %c0_16, %c0_17] : memref<1x8x128xf32, #tpu.memory_space<vmem>>, vector<1x8x128xf32>
    %48 = vector.shape_cast %46 : vector<8x128xf32> to vector<1x8x128xf32>
    %49 = arith.addf %47, %48 : vector<1x8x128xf32>
    %c0_18 = arith.constant 0 : index
    %c0_19 = arith.constant 0 : index
    %c0_20 = arith.constant 0 : index
    %50 = vector.load %arg4[%c0_18, %c0_19, %c0_20] : memref<1x8x128xf32, #tpu.memory_space<vmem>>, vector<1x8x128xf32>
    tpu.vector_store %arg4[%c0_18, %c0_19, %c0_20], %49 {strides = array<i32>} : memref<1x8x128xf32, #tpu.memory_space<vmem>>, vector<1x8x128xf32>,
    return
  }
  func.func @transform_0(%arg0: i32, %arg1: i32) -> (i32, i32) {
    %c1_i32 = arith.constant 1 : i32
    %0 = arith.muli %arg0, %c1_i32 : i32
    %1 = arith.addi %0, %arg1 : i32
    %c0_i32 = arith.constant 0 : i32
    %c0_i32_0 = arith.constant 0 : i32
    return %1, %c0_i32 : i32, i32
  }
  func.func @transform_1(%arg0: i32, %arg1: i32) -> (i32, i32) {
    %c1_i32 = arith.constant 1 : i32
    %0 = arith.muli %arg0, %c1_i32 : i32
    %1 = arith.addi %0, %arg1 : i32
    %c0_i32 = arith.constant 0 : i32
    %c0_i32_0 = arith.constant 0 : i32
    return %1, %c0_i32 : i32, i32
  }
  func.func @transform_2(%arg0: i32, %arg1: i32) -> (i32, i32, i32) {
    %c0_i32 = arith.constant 0 : i32
    %c0_i32_0 = arith.constant 0 : i32
    %c0_i32_1 = arith.constant 0 : i32
    return %arg0, %c0_i32, %c0_i32_0 : i32, i32, i32
  }
}

</mosaic_0001>

<bundles_post_ra>
// kernel: tpu_custom_call.1
= control target key start
LH: loop header
LB: loop body
LE: loop exit
PB: predicated region body
PF: predicated region fallthrough
CT: control target
= control target key end

     0   :  { %7 = vsyncpa [#allocation3], 0  ;;  %s315_s0 = inlined_call_operand.hbm [shape: f32[16,128], index: 0, kind: input, shape index: {}]   ;;  %s316_s1 = inlined_call_operand.hbm [shape: f32[16,128], index: 1, kind: input, shape index: {}]   ;;  %s317_s2 = inlined_call_operand.hbm [shape: f32[1,8,128], index: 2, kind: output, shape index: {}]  }
   0x1   :  { %8 = vsyncpa [#allocation6], 0 }
   0x2   :  { %9 = vsyncpa [#allocation4], 0  ;;  %s245_s9 = smov [#allocation2]   ;;  %s173_s13 = scalar_lea.hbm %s315_s0, 256 }
   0x3   :  { %s19_s10 = sshll.u32 %s245_s9, 4  ;;  %p174_p0 = scmp.ne.s32.totalorder %s315_s0, %s173_s13  ;;  %s20_s10 = int_to_ptr.vmem [resolvable:$true] %s19_s10 }
   0x4   :  { %p177_p1 = scmp.lt.u32.totalorder %s173_s13, %s315_s0 }
   0x6   :  { %p179_p2 = pnand %p177_p1, %p174_p0 }
   0x8   :  { %182 = shalt.err (!%p179_p2)
}
   0x9   :  { %s183_s18 = scalar_lea.vmem %s20_s10, 256  ;;  %p188_p4 = scmp.lt.s32.totalorder %s20_s10, %s20_s10 }
   0xa   :  { %p184_p3 = scmp.ne.s32.totalorder %s20_s10, %s183_s18  ;;  %p189_p5 = scmp.lt.s32.totalorder %s183_s18, %s183_s18 }
   0xc   :  { %p190_p6 = por %p189_p5, %p188_p4 }
   0xe   :  { %p191_p7 = pnand %p190_p6, %p184_p3 }
  0x10   :  { %194 = shalt.err (!%p191_p7)
}
  0x11   :  { %s246_s19 = smov 128   ;;  %s247_s20 = smov 8  }
  0x12   :  { %25 = dma.hbm_to_vmem [thread:$0]  %s315_s0, 256, %s20_s10, [#allocation3], %s246_s19, %s246_s19, %s247_s20  }
  0x13   :  { %s248_s23 = smov [#allocation5]   ;;  %s195_s27 = scalar_lea.hbm %s316_s1, 256 }
  0x14   :  { %s35_s24 = sshll.u32 %s248_s23, 4  ;;  %p196_p8 = scmp.ne.s32.totalorder %s316_s1, %s195_s27  ;;  %s36_s24 = int_to_ptr.vmem [resolvable:$true] %s35_s24 }
  0x15   :  { %p199_p9 = scmp.lt.u32.totalorder %s195_s27, %s316_s1 }
  0x17   :  { %p201_p10 = pnand %p199_p9, %p196_p8 }
  0x19   :  { %204 = shalt.err (!%p201_p10)
}
  0x1a   :  { %s205_s4 = scalar_lea.vmem %s36_s24, 256  ;;  %p210_p12 = scmp.lt.s32.totalorder %s36_s24, %s36_s24 }
  0x1b   :  { %p206_p11 = scmp.ne.s32.totalorder %s36_s24, %s205_s4  ;;  %p211_p13 = scmp.lt.s32.totalorder %s205_s4, %s205_s4 }
  0x1d   :  { %p212_p0 = por %p211_p13, %p210_p12 }
  0x1f   :  { %p213_p1 = pnand %p212_p0, %p206_p11 }
  0x21   :  { %216 = shalt.err (!%p213_p1)
}
  0x22   :  { %41 = dma.hbm_to_vmem [thread:$0]  %s316_s1, 256, %s36_s24, [#allocation6], %s246_s19, %s246_s19, %s247_s20  }
  0x23   :  { %239 = dma.done.wait [#allocation3], 256  }
  0x24   :  { %240 = vsyncadd [#allocation3], 4294967040 }
  0x25   :  { %241 = dma.done.wait [#allocation6], 256  }
  0x26   :  { %242 = vsyncadd [#allocation6], 4294967040  ;;  %v57_v0 = vld [vmem:[#allocation2] sm:$0xff]  ;;  %v58_v1 = vld [vmem:[#allocation2 + $0x8] sm:$0xff]  ;;  %s249_s1 = smov [#allocation7]  }
  0x27   :  { %v61_v2 = vand.u32 2147483647, %v57_v0  ;;  %v62_v3 = vand.u32 2147483647, %v58_v1  ;;  %v59_v19 = vld [vmem:[#allocation5] sm:$0xff]  ;;  %v69_v20 = vmax.f32 %v57_v0, 0.0 }
  0x28   :  { %v60_v25 = vld [vmem:[#allocation5 + $0x8] sm:$0xff]  ;;  %v70_v26 = vmax.f32 %v58_v1, 0.0  ;;  %v71_v27 = vmul.f32 %v59_v19, %v57_v0  ;;  %vm105_vm0 = vcmp.ge.f32.partialorder %v57_v0, 0.0  ;;  %vm106_vm1 = vcmp.ge.f32.partialorder %v58_v1, 0.0  ;;  %s145_s6 = sshll.u32 %s249_s1, 4  ;;  %s146_s6 = int_to_ptr.vmem [resolvable:$true] %s145_s6 }
  0x29   :  { %v63_v4 = vsub.f32 0.0, %v61_v2  ;;  %v64_v5 = vsub.f32 0.0, %v62_v3  ;;  %v72_v30 = vmul.f32 %v60_v25, %v58_v1  ;;  %v113_v35 = vsub.f32 1.0, %v59_v19  ;;  %s217_s7 = scalar_lea.vmem %s146_s6, 128  ;;  %p222_p3 = scmp.lt.s32.totalorder %s146_s6, %s146_s6 }
  0x2a   :  { %v73_v40 = vsub.f32 %v69_v20, %v71_v27  ;;  %v114_v43 = vsub.f32 1.0, %v60_v25  ;;  %v121_v46 = vmul.f32 0.25, %v59_v19  ;;  %v122_v50 = vmul.f32 0.25, %v60_v25  ;;  %p218_p2 = scmp.ne.s32.totalorder %s146_s6, %s217_s7  ;;  %p223_p4 = scmp.lt.s32.totalorder %s217_s7, %s217_s7 }
  0x2b   :  { %v65_v6 = vmul.f32 1.442695, %v63_v4  ;;  %v67_v7 = vmul.f32 1.442695, %v64_v5  ;;  %v74_v44 = vsub.f32 %v70_v26, %v72_v30  ;;  %v123_v47 = vmul.f32 0.75, %v113_v35 }
  0x2c   :  { %v124_v51 = vmul.f32 0.75, %v114_v43  ;;  %p224_p5 = por %p223_p4, %p222_p3 }
  0x2d   :  { %161 = vpow2.f32 %v65_v6  ;;  %v125_v60 = vadd.f32 %v123_v47, %v121_v46 }
  0x2e   :  { %163 = vpow2.f32 %v67_v7  ;;  %v126_v63 = vadd.f32 %v124_v51, %v122_v50  ;;  %p225_p6 = pnand %p224_p5, %p218_p2 }
  0x37   :  { %v162_v8 = vpop.eup %161 }
  0x38   :  { %v164_v9 = vpop.eup %163  ;;  %v75_v10 = vadd.f32 1.0, %v162_v8  ;;  %v78_v12 = vmul.f32 -0.5, %v162_v8  ;;  %v81_v21 = vand.u32 2147483647, %v162_v8 }
  0x39   :  { %v84_v11 = vadd.f32 1.0, %v164_v9  ;;  %v87_v13 = vmul.f32 -0.5, %v164_v9  ;;  %v90_v28 = vand.u32 2147483647, %v164_v9 }
  0x3a   :  { %165 = vrcp.f32 %v75_v10  ;;  %v79_v16 = vadd.f32 1.0, %v78_v12  ;;  %vm289_vm2 = vcmp.lt.f32.partialorder %v81_v21, 0.0004427343 }
  0x3b   :  { %167 = vrcp.f32 %v84_v11  ;;  %v88_v22 = vadd.f32 1.0, %v87_v13  ;;  %vm293_vm3 = vcmp.lt.f32.partialorder %v90_v28, 0.0004427343 }
  0x3c   :  { %169 = vlog2.f32 %v75_v10  ;;  %v80_v33 = vmul.f32 %v162_v8, %v79_v16 }
  0x3d   :  { %171 = vlog2.f32 %v84_v11  ;;  %v89_v38 = vmul.f32 %v164_v9, %v88_v22 }
  0x44   :  { %v166_v14 = vpop.eup %165 }
  0x45   :  { %v168_v15 = vpop.eup %167  ;;  %v99_v17 = vmul.f32 %v166_v14, %v75_v10 }
  0x46   :  { %v170_v18 = vpop.eup %169  ;;  %v100_v23 = vmul.f32 %v168_v15, %v84_v11 }
  0x47   :  { %v172_v24 = vpop.eup %171  ;;  %v101_v29 = vsub.f32 2.0, %v99_v17  ;;  %v77_v32 = vmul.f32 0.6931472, %v170_v18 }
  0x48   :  { %v102_v31 = vsub.f32 2.0, %v100_v23  ;;  %v86_v37 = vmul.f32 0.6931472, %v172_v24 }
  0x49   :  { %v103_v34 = vmul.f32 %v166_v14, %v101_v29  ;;  %v83_v48 = vsel %vm289_vm2, %v80_v33, %v77_v32 }
  0x4a   :  { %v104_v39 = vmul.f32 %v168_v15, %v102_v31  ;;  %v92_v52 = vsel %vm293_vm3, %v89_v38, %v86_v37  ;;  %v93_v58 = vadd.f32 %v83_v48, %v73_v40 }
  0x4b   :  { %v107_v42 = vmul.f32 %v162_v8, %v103_v34  ;;  %v94_v61 = vadd.f32 %v92_v52, %v74_v44 }
  0x4c   :  { %v108_v45 = vmul.f32 %v164_v9, %v104_v39  ;;  %v131_v4 = vmul.f32 %v125_v60, %v93_v58 }
  0x4d   :  { %v109_v49 = vsel %vm105_vm0, %v103_v34, %v107_v42  ;;  %v132_v6 = vmul.f32 %v126_v63, %v94_v61 }
  0x4e   :  { %v110_v53 = vsel %vm106_vm1, %v104_v39, %v108_v45  ;;  %v111_v54 = vmul.f32 %v109_v49, %v59_v19  ;;  %v115_v55 = vsub.f32 1.0, %v109_v49 }
  0x4f   :  { %v112_v56 = vmul.f32 %v110_v53, %v60_v25  ;;  %v116_v57 = vsub.f32 1.0, %v110_v53 }
  0x50   :  { %v117_v59 = vmul.f32 %v115_v55, %v113_v35 }
  0x51   :  { %v118_v62 = vmul.f32 %v116_v57, %v114_v43 }
  0x52   :  { %v119_v2 = vadd.f32 %v117_v59, %v111_v54 }
  0x53   :  { %v120_v0 = vadd.f32 %v118_v62, %v112_v56 }
  0x54   :  { %v127_v3 = vsub.f32 1.0, %v119_v2 }
  0x55   :  { %v128_v5 = vsub.f32 1.0, %v120_v0 }
  0x56   :  { %v129_v7 = vmul.f32 %v127_v3, %v127_v3 }
  0x57   :  { %v130_v8 = vmul.f32 %v128_v5, %v128_v5 }
  0x58   :  { %v133_v1 = vmul.f32 %v131_v4, %v129_v7 }
  0x59   :  { %v134_v9 = vmul.f32 %v132_v6, %v130_v8 }
  0x5b   :  { %v135_v10 = vadd.f32 %v134_v9, %v133_v1 }
  0x5d   :  { %138 = vst [vmem:[#allocation7] sm:$0xff] %v135_v10 }
  0x5e   :  { %228 = shalt.err (!%p225_p6)
}
  0x5f   :  { %s229_s10 = scalar_lea.hbm %s317_s2, 128 }
  0x60   :  { %p230_p7 = scmp.ne.s32.totalorder %s317_s2, %s229_s10  ;;  %p233_p8 = scmp.lt.u32.totalorder %s229_s10, %s317_s2 }
  0x62   :  { %p235_p9 = pnand %p233_p8, %p230_p7 }
  0x64   :  { %238 = shalt.err (!%p235_p9)
}
  0x65   :  { %148 = dma.vmem_to_hbm [thread:$0]  %s146_s6, 128, %s317_s2, [#allocation4]  }
  0x66   :  { %243 = dma.done.wait [#allocation4], 128  }
  0x67   :  { %244 = vsyncadd [#allocation4], 4294967168 }
  0x68   :  { %152 = vsyncpa [#allocation3], 1 }
  0x69   :  { %153 = vsyncpa [#allocation6], 1 }
  0x6a   :  { %154 = vsyncpa [#allocation4], 1 }

</bundles_post_ra>
